<compile_context>
chip_gen: v6e
topology: v6e:2x2x1
jax: 0.10.0
libtpu: 0.0.40
codegen_flags: <defaults>
</compile_context>

<pallas_src>
import functools

import jax
import jax.numpy as jnp
from jax.experimental import pallas as pl
from jax.experimental.pallas import tpu as pltpu


def _round_up(x, m):
    return ((x + m - 1) // m) * m


def _feature_selector_kernel(x_ref, mu_ref, noise_ref, o_ref, *, sigma, training):
    # z = mu + sigma * noise * training (training is a static 0/1 multiplier,
    # matching `* self.training` in the PyTorch forward).  Gate math is f32 on
    # a single (1, tile_d) row; it is free filler under the DMA path.
    z = mu_ref[...] + (sigma * training) * noise_ref[...]        # (1, Td) f32
    gate = jnp.clip(z + 0.5, 0.0, 1.0)                           # hard sigmoid
    x = x_ref[...]
    # Cast the gate once to the input dtype and multiply natively (bf16 stays
    # packed; f32 path unchanged).  Broadcast (1, Td) across the (Tb, Td) tile.
    o_ref[...] = (x * gate.astype(x.dtype)).astype(o_ref.dtype)


def feature_selector_forward(prev_x, mu, noise, *, sigma, training=True,
                             tile_batch=None, tile_d=None):
    """prev_x: (B, D) f32/bf16; mu, noise: (D,). Returns (B, D) in prev_x dtype."""
    B, D = prev_x.shape
    out_dtype = prev_x.dtype
    itemsize = jnp.dtype(out_dtype).itemsize

    # ---- generation-aware VMEM budget -----------------------------------
    # Double-buffered footprint ~= 2 * x_tile + 2 * out_tile = 4 * tile_bytes.
    try:
        vmem_cap = int(pltpu.get_tpu_info().vmem_capacity_bytes)
    except Exception:
        vmem_cap = 64 * 1024 * 1024                    # conservative (v7x size)
    # 48 MiB limit on v7x (64 MiB physical), 64 MiB on v5e/v6e (128 MiB).
    vmem_limit = min(64 * 1024 * 1024, (vmem_cap * 3) // 4)
    per_buf_budget = ((vmem_limit * 5) // 6) // 4      # ~10 MiB v7x, ~13 MiB v6e

    # ---- lane (D) tiling: lane-dense, multiple of 128, capped at 2048 ----
    D128 = _round_up(D, 128)
    if tile_d is None:
        tile_d = min(D128, 2048)
        if D128 % tile_d != 0:
            # Prefer an exact multiple-of-128 divisor (>=512) to avoid a ragged
            # last lane block; otherwise keep 2048 and let Pallas mask it.
            for cand in range(tile_d, 511, -128):
                if D128 % cand == 0:
                    tile_d = cand
                    break
    else:
        tile_d = min(_round_up(tile_d, 128), D128)
    grid_d = pl.cdiv(D, tile_d)

    # ---- batch tiling: largest multiple-of-8 row count within the budget ----
    if tile_batch is None:
        rows = max(8, (per_buf_budget // (tile_d * itemsize)) // 8 * 8)
        tile_batch = min(rows, _round_up(B, 8))
    else:
        tile_batch = max(8, _round_up(tile_batch, 8))
    grid_b = pl.cdiv(B, tile_batch)

    # ---- keep >= 4 grid steps on big problems so both v7x TCs stay pipelined ----
    total_bytes = B * D * itemsize
    if grid_b * grid_d < 4 and B >= 32 and total_bytes >= (2 << 20):
        want_b = pl.cdiv(4, grid_d)
        tile_batch = max(8, _round_up(pl.cdiv(B, want_b), 8))
        grid_b = pl.cdiv(B, tile_batch)

    # ---- only the tiny (1, D) mu/noise rows get padded (to grid_d * tile_d) ----
    D_mn = grid_d * tile_d
    mu2 = mu.reshape(1, D).astype(jnp.float32)
    noise2 = noise.reshape(1, D).astype(jnp.float32)
    if D_mn != D:
        mu2 = jnp.pad(mu2, ((0, 0), (0, D_mn - D)))
        noise2 = jnp.pad(noise2, ((0, 0), (0, D_mn - D)))

    kernel = functools.partial(
        _feature_selector_kernel,
        sigma=float(sigma),
        training=1.0 if training else 0.0,
    )

    # D tiles outermost, batch tiles innermost: mu/noise block index is constant
    # across the inner batch loop, so Pallas skips re-DMAing those rows.
    if grid_d > 1:
        grid = (grid_d, grid_b)
        x_map = lambda j, i: (i, j)
        g_map = lambda j, i: (0, j)
        semantics = ("parallel", "parallel")
    else:
        grid = (grid_b,)
        x_map = lambda i: (i, 0)
        g_map = lambda i: (0, 0)
        semantics = ("parallel",)

    out = pl.pallas_call(
        kernel,
        out_shape=jax.ShapeDtypeStruct((B, D), out_dtype),
        grid_spec=pltpu.PrefetchScalarGridSpec(
            num_scalar_prefetch=0,
            grid=grid,
            in_specs=[
                pl.BlockSpec((tile_batch, tile_d), x_map),   # x tile (masked at edges)
                pl.BlockSpec((1, tile_d), g_map),            # mu slice
                pl.BlockSpec((1, tile_d), g_map),            # noise slice
            ],
            out_specs=pl.BlockSpec((tile_batch, tile_d), x_map),
        ),
        compiler_params=pltpu.CompilerParams(
            dimension_semantics=semantics,
            vmem_limit_bytes=vmem_limit,
        ),
    )(prev_x, mu2, noise2)
    return out


if __name__ == "__main__":
    # Deterministic parameter / input setup (synthetic; mirrors __init__ shapes).
    input_dim = 128
    batch = 16
    sigma = 0.5

    key = jax.random.PRNGKey(0)
    k_x, k_noise = jax.random.split(key)

    prev_x = jax.random.normal(k_x, (batch, input_dim), dtype=jnp.float32)
    # nn.Parameter(torch.zeros(input_dim))  -> zeros
    mu = jnp.zeros((input_dim,), dtype=jnp.float32)
    # self.noise.normal_() is re-sampled per forward in PyTorch; here the caller
    # supplies a fresh standard-normal draw (deterministic for this test).
    # TODO(synk): caller must regenerate `noise` each training step to match normal_().
    noise = jax.random.normal(k_noise, (input_dim,), dtype=jnp.float32)

    out = feature_selector_forward(prev_x, mu, noise, sigma=sigma, training=True)
    out = jax.block_until_ready(out)

    # Reference check in plain JAX.
    z = mu + sigma * noise * 1.0
    gate = jnp.clip(z + 0.5, 0.0, 1.0)
    ref = prev_x * gate[None, :]
    assert out.shape == (batch, input_dim)
    assert jnp.allclose(out, ref, atol=1e-6, rtol=1e-6), "mismatch vs reference"

    # Ragged-shape + bf16 sanity check (exercises masked partial blocks and the
    # bf16-native multiply path; no padded x copy is made).
    prev_x2 = jax.random.normal(k_x, (13, 70), dtype=jnp.bfloat16)
    mu2 = jnp.zeros((70,), dtype=jnp.float32)
    noise2 = jax.random.normal(k_noise, (70,), dtype=jnp.float32)
    out2 = jax.block_until_ready(
        feature_selector_forward(prev_x2, mu2, noise2, sigma=sigma, training=True))
    gate2 = jnp.clip(mu2 + sigma * noise2 + 0.5, 0.0, 1.0)
    ref2 = (prev_x2.astype(jnp.float32) * gate2[None, :]).astype(jnp.bfloat16)
    assert out2.shape == (13, 70)
    assert jnp.allclose(out2.astype(jnp.float32), ref2.astype(jnp.float32),
                        atol=1e-2, rtol=1e-2), "bf16/ragged mismatch vs reference"

    # Eval-mode check (training=False -> gate = clamp(mu+0.5) = 0.5 for zero mu).
    out3 = jax.block_until_ready(
        feature_selector_forward(prev_x, mu, noise, sigma=sigma, training=False))
    assert jnp.allclose(out3, prev_x * 0.5, atol=1e-6, rtol=1e-6), "eval-mode mismatch"

    print("KERNEL_OK")
</pallas_src>

<mosaic_0001>
module attributes {stable_mosaic.version = 11 : i64} {
  func.func @_feature_selector_kernel(%arg0: i32, %arg1: memref<16x128xf32, #tpu.memory_space<vmem>>, %arg2: memref<1x128xf32, #tpu.memory_space<vmem>>, %arg3: memref<1x128xf32, #tpu.memory_space<vmem>>, %arg4: memref<16x128xf32, #tpu.memory_space<vmem>>) attributes {dimension_semantics = [#tpu.dimension_semantics<parallel>], iteration_bounds = array<i64: 1>, scalar_prefetch = 0 : i64, scratch_operands = 0 : i64, tpu.core_type = #tpu.core_type<tc>, window_params = [{transform_indices = @transform_0, window_bounds = array<i64: 16, 128>}, {pipeline_mode = #tpu.pipeline_mode<synchronous>, transform_indices = @transform_1, window_bounds = array<i64: 1, 128>}, {pipeline_mode = #tpu.pipeline_mode<synchronous>, transform_indices = @transform_2, window_bounds = array<i64: 1, 128>}, {transform_indices = @transform_3, window_bounds = array<i64: 16, 128>}]} {
    %c0 = arith.constant 0 : index
    %c0_0 = arith.constant 0 : index
    %0 = vector.load %arg2[%c0, %c0_0] : memref<1x128xf32, #tpu.memory_space<vmem>>, vector<1x128xf32>
    %c0_1 = arith.constant 0 : index
    %c0_2 = arith.constant 0 : index
    %1 = vector.load %arg3[%c0_1, %c0_2] : memref<1x128xf32, #tpu.memory_space<vmem>>, vector<1x128xf32>
    %cst = arith.constant 5.000000e-01 : f32
    %2 = vector.broadcast %cst : f32 to vector<1x128xf32>
    %3 = arith.mulf %2, %1 : vector<1x128xf32>
    %4 = arith.addf %0, %3 : vector<1x128xf32>
    %cst_3 = arith.constant 5.000000e-01 : f32
    %5 = vector.broadcast %cst_3 : f32 to vector<1x128xf32>
    %6 = arith.addf %4, %5 : vector<1x128xf32>
    %cst_4 = arith.constant 0.000000e+00 : f32
    %cst_5 = arith.constant 1.000000e+00 : f32
    %7 = vector.broadcast %cst_4 : f32 to vector<1x128xf32>
    %8 = arith.maximumf %7, %6 : vector<1x128xf32>
    %9 = vector.broadcast %cst_5 : f32 to vector<1x128xf32>
    %10 = arith.minimumf %9, %8 : vector<1x128xf32>
    %c0_6 = arith.constant 0 : index
    %c0_7 = arith.constant 0 : index
    %11 = vector.load %arg1[%c0_6, %c0_7] : memref<16x128xf32, #tpu.memory_space<vmem>>, vector<16x128xf32>
    %12 = vector.broadcast %10 : vector<1x128xf32> to vector<16x128xf32>
    %13 = arith.mulf %11, %12 : vector<16x128xf32>
    %c0_8 = arith.constant 0 : index
    %c0_9 = arith.constant 0 : index
    %14 = vector.load %arg4[%c0_8, %c0_9] : memref<16x128xf32, #tpu.memory_space<vmem>>, vector<16x128xf32>
    tpu.vector_store %arg4[%c0_8, %c0_9], %13 {strides = array<i32>} : memref<16x128xf32, #tpu.memory_space<vmem>>, vector<16x128xf32>,
    return
  }
  func.func @transform_0(%arg0: i32) -> (i32, i32) {
    %c0_i32 = arith.constant 0 : i32
    %c0_i32_0 = arith.constant 0 : i32
    return %arg0, %c0_i32 : i32, i32
  }
  func.func @transform_1(%arg0: i32) -> (i32, i32) {
    %c0_i32 = arith.constant 0 : i32
    %c0_i32_0 = arith.constant 0 : i32
    %c0_i32_1 = arith.constant 0 : i32
    return %c0_i32, %c0_i32_0 : i32, i32
  }
  func.func @transform_2(%arg0: i32) -> (i32, i32) {
    %c0_i32 = arith.constant 0 : i32
    %c0_i32_0 = arith.constant 0 : i32
    %c0_i32_1 = arith.constant 0 : i32
    return %c0_i32, %c0_i32_0 : i32, i32
  }
  func.func @transform_3(%arg0: i32) -> (i32, i32) {
    %c0_i32 = arith.constant 0 : i32
    %c0_i32_0 = arith.constant 0 : i32
    return %arg0, %c0_i32 : i32, i32
  }
}

</mosaic_0001>

<bundles_post_ra>
// kernel: tpu_custom_call.1
= control target key start
LH: loop header
LB: loop body
LE: loop exit
PB: predicated region body
PF: predicated region fallthrough
CT: control target
= control target key end

     0   :  { %8 = vsyncpa [#allocation3], 0  ;;  %s155_s0 = inlined_call_operand.hbm [shape: f32[16,128], index: 0, kind: input, shape index: {}]   ;;  %s156_s1 = inlined_call_operand.vmem [shape: f32[1,128], index: 1, kind: input, shape index: {}]   ;;  %s157_s2 = inlined_call_operand.vmem [shape: f32[1,128], index: 2, kind: input, shape index: {}]   ;;  %s158_s3 = inlined_call_operand.hbm [shape: f32[16,128], index: 3, kind: output, shape index: {}]  }
   0x1   :  { %9 = vsyncpa [#allocation4], 0  ;;  %s113_s12 = smov [#allocation2]  }
   0x2   :  { %s15_s13 = sshll.u32 %s113_s12, 4  ;;  %s16_s13 = int_to_ptr.vmem [resolvable:$true] %s15_s13 }
   0x3   :  { %s77_s14 = scalar_lea.vmem %s16_s13, 256  ;;  %p82_p1 = scmp.lt.s32.totalorder %s16_s13, %s16_s13 }
   0x4   :  { %p78_p0 = scmp.ne.s32.totalorder %s16_s13, %s77_s14  ;;  %p83_p2 = scmp.lt.s32.totalorder %s77_s14, %s77_s14 }
   0x6   :  { %p84_p3 = por %p83_p2, %p82_p1 }
   0x8   :  { %p85_p4 = pnand %p84_p3, %p78_p0 }
   0xa   :  { %88 = shalt.err (!%p85_p4)
}
   0xb   :  { %s114_s15 = smov 128   ;;  %s115_s16 = smov 8  }
   0xc   :  { %21 = dma.hbm_to_vmem [thread:$0]  %s155_s0, 256, %s16_s13, [#allocation3], %s114_s15, %s114_s15, %s115_s16  }
   0xd   :  { %109 = dma.done.wait [#allocation3], 256  }
   0xe   :  { %110 = vsyncadd [#allocation3], 4294967040  ;;  %v39_v0 = vlaneseq  ;;  %v29_v1 = vld [vmem:[%s156_s1] sm:$0x1]  ;;  %v37_v11 = vld [vmem:[#allocation2 + $0x8] sm:$0xff]  ;;  %s116_s0 = smov [#allocation5]  }
   0xf   :  { %v30_v2 = vld [vmem:[%s157_s2] sm:$0x1]  ;;  %s53_s23 = sshll.u32 %s116_s0, 4  ;;  %s54_s23 = int_to_ptr.vmem [resolvable:$true] %s53_s23 }
  0x10   :  { %v31_v3 = vmul.f32 0.5, %v30_v2  ;;  %v40_v5 = vshrl.u32 %v39_v0, 7  ;;  %v36_v10 = vld [vmem:[#allocation2] sm:$0xff]  ;;  %s89_s1 = scalar_lea.vmem %s54_s23, 256  ;;  %p94_p6 = scmp.lt.s32.totalorder %s54_s23, %s54_s23 }
  0x11   :  { %p90_p5 = scmp.ne.s32.totalorder %s54_s23, %s89_s1  ;;  %p95_p7 = scmp.lt.s32.totalorder %s89_s1, %s89_s1 }
  0x12   :  { %v32_v4 = vadd.f32 %v31_v3, %v29_v1  ;;  %v41_v8 = vsub.s32 0, %v40_v5 }
  0x13   :  { %p96_p8 = por %p95_p7, %p94_p6 }
  0x14   :  { %v33_v6 = vadd.f32 0.5, %v32_v4 }
  0x15   :  { %p97_p9 = pnand %p96_p8, %p90_p5 }
  0x16   :  { %v34_v7 = vmax.f32 %v33_v6, 0.0 }
  0x18   :  { %v35_v9 = vmin.f32 %v34_v7, 1.0 }
  0x1a   :  { %v42_v12 = vrot.slane %v35_v9, %v41_v8 }
  0x1c   :  { %v44_v13 = vmul.f32 %v42_v12, %v36_v10  ;;  %v45_v14 = vmul.f32 %v42_v12, %v37_v11 }
  0x1e   :  { %46 = vst [vmem:[#allocation5] sm:$0xff] %v44_v13  ;;  %47 = vst [vmem:[#allocation5 + $0x8] sm:$0xff] %v45_v14 }
  0x1f   :  { %100 = shalt.err (!%p97_p9)
}
  0x20   :  { %59 = dma.vmem_to_hbm [thread:$0]  %s54_s23, 256, %s158_s3, [#allocation4], %s114_s15, %s114_s15, %s115_s16  }
  0x21   :  { %111 = dma.done.wait [#allocation4], 256  }
  0x22   :  { %112 = vsyncadd [#allocation4], 4294967040 }
  0x23   :  { %63 = vsyncpa [#allocation3], 1 }
  0x24   :  { %64 = vsyncpa [#allocation4], 1 }

</bundles_post_ra>
